<compile_context>
chip_gen: v6e
topology: v6e:2x2x1
jax: 0.10.0
libtpu: 0.0.40
codegen_flags: <defaults>
</compile_context>

<pallas_src>
import jax
import jax.numpy as jnp
from jax import lax
from jax.experimental import pallas as pl
from jax.experimental.pallas import tpu as pltpu


def _round_up(x, m):
    return (x + m - 1) // m * m


def _linear_grt_kernel(x_ref, dirs_ref, o_ref):
    # One (tm, K) tile of x against the resident (K, D_pad) normalized
    # direction matrix on the MXU; f32 accumulation regardless of input dtype.
    o_ref[...] = jnp.dot(
        x_ref[...], dirs_ref[...], preferred_element_type=jnp.float32
    ).astype(o_ref.dtype)


def linear_grt_forward(x, theta, *, projection_dim=-1, block_m=512):
    """Pallas forward of LinearGRT: out = x @ (theta / ||theta||_col)."""
    ndim = x.ndim
    if projection_dim != -1 and projection_dim != ndim - 1:
        # Match PyTorch: move projection_dim to the last axis, project, move back.
        perm = [i for i in range(ndim) if i != projection_dim] + [projection_dim]
        x = jnp.transpose(x, perm)

    *lead, k = x.shape
    k_t, d = theta.shape
    assert k_t == k, "x last dim must equal theta first dim"

    m = 1
    for s in lead:
        m *= s
    x2d = x.reshape(m, k)

    # --- Hoisted, amortized theta normalization (one rsqrt instead of
    # sqrt + reciprocal; done once per call, not once per grid step).
    theta_f32 = theta.astype(jnp.float32)
    inv_norm = lax.rsqrt(jnp.sum(theta_f32 * theta_f32, axis=0, keepdims=True))
    directions = (theta_f32 * inv_norm).astype(x.dtype)

    # --- Lane-dense output: pad the directions axis to a multiple of 128.
    d_pad = max(_round_up(d, 128), 128)
    if d_pad != d:
        directions = jnp.pad(directions, ((0, 0), (0, d_pad - d)))

    # --- Tile M; pad rows so every tile is full (keeps the (8,128) block
    # constraint satisfied and all stores unmasked).
    tm = min(block_m, max(_round_up(m, 8), 8))
    m_pad = _round_up(m, tm)
    if m_pad != m:
        x2d = jnp.pad(x2d, ((0, m_pad - m), (0, 0)))

    grid = (m_pad // tm,)

    itemsize = jnp.dtype(x.dtype).itemsize
    # Double-buffered working set: x tile, directions block, output tile.
    vmem_need = 2 * (tm * k + k * d_pad + tm * d_pad) * itemsize + (4 << 20)
    vmem_limit = int(min(max(vmem_need, 16 << 20), 48 << 20))  # fits v7x's 64 MiB

    out2d = pl.pallas_call(
        _linear_grt_kernel,
        out_shape=jax.ShapeDtypeStruct((m_pad, d_pad), x.dtype),
        grid_spec=pltpu.PrefetchScalarGridSpec(
            num_scalar_prefetch=0,
            grid=grid,
            in_specs=[
                pl.BlockSpec((tm, k), lambda i: (i, 0)),
                pl.BlockSpec((k, d_pad), lambda i: (0, 0)),
            ],
            out_specs=pl.BlockSpec((tm, d_pad), lambda i: (i, 0)),
        ),
        compiler_params=pltpu.CompilerParams(
            dimension_semantics=("parallel",),
            vmem_limit_bytes=vmem_limit,
        ),
        cost_estimate=pl.CostEstimate(
            flops=2 * m_pad * k * d_pad,
            transcendentals=0,
            bytes_accessed=(m_pad * k + k * d_pad + m_pad * d_pad) * itemsize,
        ),
    )(x2d, directions)

    out = out2d[:m, :d].reshape(*lead, d)

    if projection_dim != -1 and projection_dim != ndim - 1:
        # Inverse permutation: put the directions axis back at projection_dim.
        inv = list(range(projection_dim)) + [ndim - 1] + list(range(projection_dim, ndim - 1))
        out = jnp.transpose(out, inv)
    return out


if __name__ == "__main__":
    key = jax.random.PRNGKey(0)
    k_x, k_theta = jax.random.split(key)

    batch, seq, in_features, directions = 2, 8, 32, 16

    # Deterministic "randn"-style inputs (mirrors torch.randn in __init__).
    x = jax.random.normal(k_x, (batch, seq, in_features), dtype=jnp.float32)
    theta = jax.random.normal(k_theta, (in_features, directions), dtype=jnp.float32)

    out = linear_grt_forward(x, theta)
    out = jax.block_until_ready(out)

    # Pure-JAX reference of the same math (high-precision matmul).
    dirs_ref = theta / jnp.linalg.norm(theta, axis=0, keepdims=True)
    ref = jnp.einsum("bsk,kd->bsd", x, dirs_ref, precision=lax.Precision.HIGHEST)

    assert out.shape == (batch, seq, directions)
    assert jnp.allclose(out, ref, atol=1e-4, rtol=1e-4)

    print("KERNEL_OK")
</pallas_src>

<mosaic_0001>
module attributes {stable_mosaic.version = 11 : i64} {
  func.func @_linear_grt_kernel(%arg0: i32, %arg1: memref<16x32xf32, #tpu.memory_space<vmem>>, %arg2: memref<32x128xf32, #tpu.memory_space<vmem>>, %arg3: memref<16x128xf32, #tpu.memory_space<vmem>>) attributes {dimension_semantics = [#tpu.dimension_semantics<parallel>], iteration_bounds = array<i64: 1>, scalar_prefetch = 0 : i64, scratch_operands = 0 : i64, tpu.core_type = #tpu.core_type<tc>, window_params = [{transform_indices = @transform_0, window_bounds = array<i64: 16, 32>}, {pipeline_mode = #tpu.pipeline_mode<synchronous>, transform_indices = @transform_1, window_bounds = array<i64: 32, 128>}, {transform_indices = @transform_2, window_bounds = array<i64: 16, 128>}]} {
    %c0 = arith.constant 0 : index
    %c0_0 = arith.constant 0 : index
    %0 = vector.load %arg1[%c0, %c0_0] : memref<16x32xf32, #tpu.memory_space<vmem>>, vector<16x32xf32>
    %c0_1 = arith.constant 0 : index
    %c0_2 = arith.constant 0 : index
    %1 = vector.load %arg2[%c0_1, %c0_2] : memref<32x128xf32, #tpu.memory_space<vmem>>, vector<32x128xf32>
    %cst = arith.constant dense<0.000000e+00> : vector<16x128xf32>
    %2 = tpu.matmul %0, %1, %cst {dimension_numbers = #tpu.dot_dimension_numbers<[1], [0], [0], [1], [0, 0, 1, 1], [], []>} : vector<16x32xf32>, vector<32x128xf32>, vector<16x128xf32> -> vector<16x128xf32>
    %c0_3 = arith.constant 0 : index
    %c0_4 = arith.constant 0 : index
    %3 = vector.load %arg3[%c0_3, %c0_4] : memref<16x128xf32, #tpu.memory_space<vmem>>, vector<16x128xf32>
    tpu.vector_store %arg3[%c0_3, %c0_4], %2 {strides = array<i32>} : memref<16x128xf32, #tpu.memory_space<vmem>>, vector<16x128xf32>,
    return
  }
  func.func @transform_0(%arg0: i32) -> (i32, i32) {
    %c0_i32 = arith.constant 0 : i32
    %c0_i32_0 = arith.constant 0 : i32
    return %arg0, %c0_i32 : i32, i32
  }
  func.func @transform_1(%arg0: i32) -> (i32, i32) {
    %c0_i32 = arith.constant 0 : i32
    %c0_i32_0 = arith.constant 0 : i32
    %c0_i32_1 = arith.constant 0 : i32
    return %c0_i32, %c0_i32_0 : i32, i32
  }
  func.func @transform_2(%arg0: i32) -> (i32, i32) {
    %c0_i32 = arith.constant 0 : i32
    %c0_i32_0 = arith.constant 0 : i32
    return %arg0, %c0_i32 : i32, i32
  }
}

</mosaic_0001>

<bundles_post_ra>
// kernel: tpu_custom_call.1
= control target key start
LH: loop header
LB: loop body
LE: loop exit
PB: predicated region body
PF: predicated region fallthrough
CT: control target
= control target key end

     0   :  { %7 = vsyncpa [#allocation3], 0  ;;  %s278_s0 = inlined_call_operand.hbm [shape: f32[16,32], index: 0, kind: input, shape index: {}]   ;;  %s279_s1 = inlined_call_operand.hbm [shape: f32[32,128], index: 1, kind: input, shape index: {}]   ;;  %s280_s2 = inlined_call_operand.hbm [shape: f32[16,128], index: 2, kind: output, shape index: {}]  }
   0x1   :  { %8 = vsyncpa [#allocation6], 0 }
   0x2   :  { %9 = vsyncpa [#allocation4], 0  ;;  %s238_s9 = smov [#allocation2]  }
   0x3   :  { %s15_s10 = sshll.u32 %s238_s9, 4  ;;  %s16_s10 = int_to_ptr.vmem [resolvable:$true] %s15_s10 }
   0x4   :  { %s180_s11 = scalar_lea.vmem %s16_s10, 256  ;;  %p185_p1 = scmp.lt.s32.totalorder %s16_s10, %s16_s10 }
   0x5   :  { %p181_p0 = scmp.ne.s32.totalorder %s16_s10, %s180_s11  ;;  %p186_p2 = scmp.lt.s32.totalorder %s180_s11, %s180_s11 }
   0x7   :  { %p187_p3 = por %p186_p2, %p185_p1 }
   0x9   :  { %p188_p4 = pnand %p187_p3, %p181_p0 }
   0xb   :  { %191 = shalt.err (!%p188_p4)
}
   0xc   :  { %s239_s12 = smov 128   ;;  %s240_s13 = smov 8  }
   0xd   :  { %21 = dma.hbm_to_vmem [thread:$0]  %s278_s0, 256, %s16_s10, [#allocation3], %s239_s12, %s239_s12, %s240_s13  }
   0xe   :  { %s241_s16 = smov [#allocation5]  }
   0xf   :  { %s27_s17 = sshll.u32 %s241_s16, 4  ;;  %s28_s17 = int_to_ptr.vmem [resolvable:$true] %s27_s17 }
  0x10   :  { %s200_s18 = scalar_lea.vmem %s28_s17, 512  ;;  %p205_p6 = scmp.lt.s32.totalorder %s28_s17, %s28_s17 }
  0x11   :  { %p201_p5 = scmp.ne.s32.totalorder %s28_s17, %s200_s18  ;;  %p206_p7 = scmp.lt.s32.totalorder %s200_s18, %s200_s18 }
  0x13   :  { %p207_p8 = por %p206_p7, %p205_p6 }
  0x15   :  { %p208_p9 = pnand %p207_p8, %p201_p5 }
  0x17   :  { %211 = shalt.err (!%p208_p9)
}
  0x18   :  { %33 = dma.hbm_to_vmem [thread:$0]  %s279_s1, 512, %s28_s17, [#allocation6], %s239_s12, %s239_s12, %s240_s13  }
  0x19   :  { %232 = dma.done.wait [#allocation3], 256  }
  0x1a   :  { %233 = vsyncadd [#allocation3], 4294967040 }
  0x1b   :  { %234 = dma.done.wait [#allocation6], 512  }
  0x1c   :  { %235 = vsyncadd [#allocation6], 4294966784  ;;  %vm46_vm0 = vcmask 261120   ;;  %v45_v0 = vld [vmem:[#allocation5 + $0x18] sm:$0xff]  ;;  %v44_v1 = vld [vmem:[#allocation5 + $0x10] sm:$0xff]  ;;  %s242_s0 = smov [#allocation7]  }
  0x1d   :  { %156 = vmatprep.subr.mxu0 %v45_v0  ;;  %v40_v2 = vld [vmem:[#allocation2] sm:$0xff]  ;;  %v43_v3 = vld [vmem:[#allocation5 + $0x8] sm:$0xff]  ;;  %v42_v4 = vld [vmem:[#allocation5] sm:$0xff]  ;;  %s135_s1 = sshll.u32 %s242_s0, 4  ;;  %s136_s1 = int_to_ptr.vmem [resolvable:$true] %s135_s1 }
  0x1e   :  { %157 = vmatpush3.msra.mxu0 %v45_v0  ;;  %164 = vmatprep.mubr.msk.f32.mxu0 %vm46_vm0, %v40_v2  ;;  %v41_v5 = vld [vmem:[#allocation2 + $0x8] sm:$0xff]  ;;  %s212_s21 = scalar_lea.vmem %s136_s1, 256  ;;  %p217_p11 = scmp.lt.s32.totalorder %s136_s1, %s136_s1 }
  0x1f   :  { %158 = vmatprep.subr.mxu0 %v44_v1  ;;  %p213_p10 = scmp.ne.s32.totalorder %s136_s1, %s212_s21  ;;  %p218_p12 = scmp.lt.s32.totalorder %s212_s21, %s212_s21 }
  0x20   :  { %159 = vmatpush3.msra.mxu0 %v44_v1 }
  0x21   :  { %160 = vmatprep.subr.mxu0 %v43_v3  ;;  %p219_p13 = por %p218_p12, %p217_p11 }
  0x22   :  { %161 = vmatpush3.msra.mxu0 %v43_v3 }
  0x23   :  { %162 = vmatprep.subr.mxu0 %v42_v4  ;;  %p220_p0 = pnand %p219_p13, %p213_p10 }
  0x24   :  { %163 = vmatpush3.msra.mxu0 %v42_v4 }
  0x25   :  { %165 = vmatmul.mubr.msk.f32.vlgmr.msra.gmra.mxu0 %vm46_vm0, %v41_v5 }
  0xe5   :  { %v166_v6 = vpop.f32.mrf.mxu0 }
  0xe6   :  { %129 = vst [vmem:[#allocation7 + $0x8] sm:$0xff] %v166_v6 }
  0xe7   :  { %v119_v7 = vpop.f32.mrf.mxu0 }
  0xe8   :  { %128 = vst [vmem:[#allocation7] sm:$0xff] %v119_v7 }
  0xe9   :  { %223 = shalt.err (!%p220_p0)
}
  0xea   :  { %141 = dma.vmem_to_hbm [thread:$0]  %s136_s1, 256, %s280_s2, [#allocation4], %s239_s12, %s239_s12, %s240_s13  }
  0xeb   :  { %236 = dma.done.wait [#allocation4], 256  }
  0xec   :  { %237 = vsyncadd [#allocation4], 4294967040 }
  0xed   :  { %145 = vsyncpa [#allocation3], 1 }
  0xee   :  { %146 = vsyncpa [#allocation6], 1 }
  0xef   :  { %147 = vsyncpa [#allocation4], 1 }

</bundles_post_ra>
